<compile_context>
chip_gen: v5e
topology: v5e:2x2
jax: 0.10.0
libtpu: 0.0.40
codegen_flags: <defaults>
</compile_context>

<pallas_src>
import jax
import jax.numpy as jnp
from jax.experimental import pallas as pl
from jax.experimental.pallas import tpu as pltpu


def _round_up(x, m):
    return (x + m - 1) // m * m


def _cdiv(a, b):
    return -(-a // b)


def _normalize_kernel(x_ref, sb_ref, o_ref):
    # x_ref:  (block_rows, block_hw) VMEM tile of the flattened image
    # sb_ref: (block_rows, 2)        per-row [scale, bias]; index_map constant
    #                                along the HW grid axis
    # o_ref:  (block_rows, block_hw)
    sb = sb_ref[...]
    scale = sb[:, 0:1]          # (block_rows, 1) -> broadcasts across lanes
    bias = sb[:, 1:2]
    o_ref[...] = x_ref[...] * scale + bias


def normalization(img, mean, std):
    """img: (N, C, H, W); mean/std: (C,). Returns (img - mean)/std per channel."""
    N, C, H, W = img.shape
    NC, HW = N * C, H * W
    dtype = img.dtype
    dtype_size = jnp.dtype(dtype).itemsize

    # ---- tile sizing: lane-dense 2-D tiles, ~2 MiB per buffer -------------
    target_block_bytes = 2 * 1024 * 1024
    elems_per_block = max(1024, target_block_bytes // dtype_size)

    nc8 = _round_up(NC, 8)
    hw128 = _round_up(HW, 128)

    # HW chunk: whole (padded) HW if it fits the budget with >= 8 rows,
    # otherwise the smallest number of 128-multiple chunks that does.
    max_block_hw = max(128, (elems_per_block // 8) // 128 * 128)
    if hw128 <= max_block_hw:
        block_hw = hw128
    else:
        n_hw_chunks = _cdiv(hw128, max_block_hw)
        block_hw = _round_up(_cdiv(hw128, n_hw_chunks), 128)

    # Row chunk: fill the remaining budget in multiples of 8, minimal padding.
    max_block_rows = max(8, (elems_per_block // block_hw) // 8 * 8)
    if nc8 <= max_block_rows:
        block_rows = nc8
    else:
        n_row_chunks = _cdiv(nc8, max_block_rows)
        block_rows = _round_up(_cdiv(nc8, n_row_chunks), 8)

    # v7x has 2 TensorCores: ensure >= 2 grid steps when the problem allows it,
    # so the degenerate single-block case still shards across cores.
    if _cdiv(nc8, block_rows) * _cdiv(hw128, block_hw) < 2:
        if hw128 // 128 >= 2:
            block_hw = ((hw128 // 128 + 1) // 2) * 128
        elif nc8 // 8 >= 2:
            block_rows = ((nc8 // 8 + 1) // 2) * 8

    NC_pad = _round_up(NC, block_rows)
    HW_pad = _round_up(HW, block_hw)
    grid = (NC_pad // block_rows, HW_pad // block_hw)

    # ---- glue: flatten, fold divide into scale/bias, pad to tile multiples -
    x2 = img.reshape(NC, HW)
    if NC_pad != NC or HW_pad != HW:
        x2 = jnp.pad(x2, ((0, NC_pad - NC), (0, HW_pad - HW)))

    scale = (1.0 / std).astype(dtype)                  # (C,)
    bias = (-mean / std).astype(dtype)                 # (C,)
    sb = jnp.stack([jnp.tile(scale, (N,)),
                    jnp.tile(bias, (N,))], axis=-1)    # (NC, 2)
    if NC_pad != NC:
        sb = jnp.pad(sb, ((0, NC_pad - NC), (0, 0)))

    out2 = pl.pallas_call(
        _normalize_kernel,
        out_shape=jax.ShapeDtypeStruct((NC_pad, HW_pad), dtype),
        grid_spec=pltpu.PrefetchScalarGridSpec(
            num_scalar_prefetch=0,
            grid=grid,
            in_specs=[
                pl.BlockSpec((block_rows, block_hw), lambda i, j: (i, j)),
                # stats tile: constant along j (the HW axis)
                pl.BlockSpec((block_rows, 2), lambda i, j: (i, 0)),
            ],
            out_specs=pl.BlockSpec((block_rows, block_hw), lambda i, j: (i, j)),
        ),
        compiler_params=pltpu.CompilerParams(
            dimension_semantics=("parallel", "parallel"),
        ),
    )(x2, sb)

    if NC_pad != NC or HW_pad != HW:
        out2 = out2[:NC, :HW]
    return out2.reshape(N, C, H, W)


if __name__ == "__main__":
    key = jax.random.PRNGKey(0)
    k_img, _ = jax.random.split(key)

    N, C, H, W = 2, 4, 16, 16
    img = jax.random.normal(k_img, (N, C, H, W), dtype=jnp.float32)

    # Deterministic "ImageNet-like" per-channel stats for C=4 channels.
    mean = jnp.array([0.485, 0.456, 0.406, 0.5], dtype=jnp.float32)
    std = jnp.array([0.229, 0.224, 0.225, 0.25], dtype=jnp.float32)

    out = normalization(img, mean, std)
    out = jax.block_until_ready(out)

    # Reference (plain JAX, mirrors PyTorch broadcasting of (C,1,1) stats).
    ref = (img - mean.reshape(-1, 1, 1)) / std.reshape(-1, 1, 1)

    assert out.shape == img.shape and out.dtype == img.dtype
    # scale/bias fold differs from true division only at the ULP level
    assert jnp.allclose(out, ref, atol=1e-5, rtol=1e-5)
    print("KERNEL_OK")
</pallas_src>

<mosaic_0001>
module attributes {stable_mosaic.version = 11 : i64} {
  func.func @_normalize_kernel(%arg0: i32, %arg1: i32, %arg2: memref<8x128xf32, #tpu.memory_space<vmem>>, %arg3: memref<8x2xf32, #tpu.memory_space<vmem>>, %arg4: memref<8x128xf32, #tpu.memory_space<vmem>>) attributes {dimension_semantics = [#tpu.dimension_semantics<parallel>, #tpu.dimension_semantics<parallel>], iteration_bounds = array<i64: 1, 2>, scalar_prefetch = 0 : i64, scratch_operands = 0 : i64, tpu.core_type = #tpu.core_type<tc>, window_params = [{transform_indices = @transform_0, window_bounds = array<i64: 8, 128>}, {transform_indices = @transform_1, window_bounds = array<i64: 8, 2>}, {transform_indices = @transform_2, window_bounds = array<i64: 8, 128>}]} {
    %c0 = arith.constant 0 : index
    %c0_0 = arith.constant 0 : index
    %0 = vector.load %arg3[%c0, %c0_0] : memref<8x2xf32, #tpu.memory_space<vmem>>, vector<8x2xf32>
    %1 = vector.extract_strided_slice %0 {offsets = [0, 0], sizes = [8, 1], strides = [1, 1]} : vector<8x2xf32> to vector<8x1xf32>
    %2 = vector.extract_strided_slice %0 {offsets = [0, 1], sizes = [8, 1], strides = [1, 1]} : vector<8x2xf32> to vector<8x1xf32>
    %c0_1 = arith.constant 0 : index
    %c0_2 = arith.constant 0 : index
    %3 = vector.load %arg2[%c0_1, %c0_2] : memref<8x128xf32, #tpu.memory_space<vmem>>, vector<8x128xf32>
    %4 = vector.broadcast %1 : vector<8x1xf32> to vector<8x128xf32>
    %5 = arith.mulf %3, %4 : vector<8x128xf32>
    %6 = vector.broadcast %2 : vector<8x1xf32> to vector<8x128xf32>
    %7 = arith.addf %5, %6 : vector<8x128xf32>
    %c0_3 = arith.constant 0 : index
    %c0_4 = arith.constant 0 : index
    %8 = vector.load %arg4[%c0_3, %c0_4] : memref<8x128xf32, #tpu.memory_space<vmem>>, vector<8x128xf32>
    tpu.vector_store %arg4[%c0_3, %c0_4], %7 {strides = array<i32>} : memref<8x128xf32, #tpu.memory_space<vmem>>, vector<8x128xf32>,
    return
  }
  func.func @transform_0(%arg0: i32, %arg1: i32) -> (i32, i32) {
    %c0_i32 = arith.constant 0 : i32
    return %arg0, %arg1 : i32, i32
  }
  func.func @transform_1(%arg0: i32, %arg1: i32) -> (i32, i32) {
    %c0_i32 = arith.constant 0 : i32
    %c0_i32_0 = arith.constant 0 : i32
    return %arg0, %c0_i32 : i32, i32
  }
  func.func @transform_2(%arg0: i32, %arg1: i32) -> (i32, i32) {
    %c0_i32 = arith.constant 0 : i32
    return %arg0, %arg1 : i32, i32
  }
}

</mosaic_0001>

<bundles_post_ra>
// kernel: tpu_custom_call.1
= control target key start
LH: loop header
LB: loop body
LE: loop exit
PB: predicated region body
PF: predicated region fallthrough
CT: control target
= control target key end

     0   :  { %7 = vsyncpa [#allocation3], 0  ;;  %s659_s0 = inlined_call_operand.hbm [shape: f32[8,256], index: 0, kind: input, shape index: {}]   ;;  %s660_s1 = inlined_call_operand.vmem [shape: f32[8,2], index: 1, kind: input, shape index: {}]   ;;  %s661_s2 = inlined_call_operand.hbm [shape: f32[8,256], index: 2, kind: output, shape index: {}]  }
   0x1   :  { %9 = vsyncpa [#allocation3 + $0x1], 0 }
   0x2   :  { %10 = vsyncpa [#allocation4], 0 }
   0x3   :  { %12 = vsyncpa [#allocation4 + $0x1], 0  ;;  %s536_s9 = smov 0   ;;  %s538_s10 = smov 0  }
   0x4   :  { %s540_s11 = smov 0   ;;  %s542_s12 = smov 0  }
   0x5   :  { %s544_s13 = smov 0   ;;  %s546_s14 = smov 0  }
   0x6 LB: > { %s325_s15 = sadd.s32 4294967295, %s517_s14   ;;  %s326_s16 = sadd.s32 4294967294, %s517_s14   ;;  %s517_s14 = sphi %s546_s14, %s18_s14   ;;  %s513_s13 = sphi %s544_s13, %s670_s13   ;;  %s509_s12 = sphi %s542_s12, %s669_s12   ;;  %s505_s11 = sphi %s540_s11, %s668_s11   ;;  %s501_s10 = sphi %s538_s10, %s667_s10   ;;  %s497_s9 = sphi %s536_s9, %s666_s9  }
   0x7   : > { %s27_s17 = sadd.s32 1, %s513_s13  ;;  %s39_s18 = sadd.s32 1, %s505_s11 }
   0x8   : > { %p28_p0 = scmp.ge.s32.totalorder %s27_s17, 2  ;;  %p46_p1 = scmp.ne.s32.totalorder %s505_s11, %s501_s10 }
   0x9   : > { %p47_p2 = scmp.eq.s32.totalorder %s517_s14, 0  ;;  %p52_p3 = scmp.ne.s32.totalorder %s501_s10, %s497_s9 }
   0xa   : > { %s672_s17 = smov (%p28_p0, %s27_s17), 0  ;;  %p53_p5 = scmp.eq.s32.totalorder %s325_s15, 0 }
   0xb   : > { %p577_p4 = por %p47_p2, %p46_p1  ;;  %s35_s20 = ssub.s32 %s513_s13, %s672_s17 }
   0xc   : > { %p104_p6 = scmp.eq.s32.totalorder %s325_s15, 1  ;;  %p37_p7 = scmp.eq.s32.totalorder %s35_s20, 0 }
   0xd   : > { %p583_p8 = por %p53_p5, %p52_p3  ;;  %p110_p10 = scmp.eq.s32.totalorder %s326_s16, 1 }
   0xe   : > { %p587_p9 = por %p104_p6, %p46_p1  ;;  %p329_p12 = scmp.ge.s32.totalorder %s517_s14, 2 }
   0xf   : > { %s592_s23 = scalar_select %p37_p7, %s505_s11, %s39_s18  }
  0x10   : > { %p594_p11 = por %p110_p10, %p52_p3  ;;  %p351_p13 = scmp.lt.s32.totalorder %s517_s14, 2 }
  0x11   : > { %s137_s25 = sand.u32 1, %s505_s11   ;;  %s331_s27 = sshll.u32 %s513_s13, 3 }
  0x12   : > { %s330_s26 = sshll.u32 %s137_s25, 3  ;;  %s147_s30 = scalar_lea.hbm %s659_s0, %s331_s27 }
  0x13   : > { %s141_s3 = scalar_lea.vmem [#allocation2], %s330_s26  ;;  %s149_s5 = sshll.u32 %s147_s30, 4  ;;  %s150_s5 = int_to_ptr.hbm [resolvable:$true] %s149_s5 }
  0x14   : > { %s151_s4 = sshll.u32 %s141_s3, 4  ;;  %p344_p0 = pnand %p351_p13, %p577_p4  ;;  %s152_s4 = int_to_ptr.vmem [resolvable:$true] %s151_s4 }
  0x15   : > { %p332_p1 = scmp.ge.s32.totalorder %s517_s14, 1  ;;  %p156_p2 = scmp.lt.s32.totalorder %s517_s14, 3 }
  0x16   : > { %s138_s6 = scalar_lea.sflag [#allocation3], %s137_s25 }
  0x17   : > { %346 = dma.hbm_to_vmem [thread:$0]  (!%p344_p0), %s150_s5, 128, %s152_s4, %s138_s6  }
  0x18   : > { %p157_p3 = pnand %p332_p1, %p156_p2 }
  0x19   : > { %s610_s7 = sand.u32 (!%p157_p3), 1, %s501_s10  }
  0x1a   : > { %160 = sbr.rel (%p157_p3) target bundleno = 163 (0xa3), region = 28  ;;  %s333_s8 = sshll.u32 (!%p157_p3), %s610_s7, 3 }
  0x1b   : > { %s163_s15 = scalar_lea.sflag (!%p157_p3), [#allocation3], %s610_s7  ;;  %s166_s16 = scalar_lea.vmem (!%p157_p3), [#allocation2], %s333_s8 }
  0x1f   : > { %488 = dma.done.wait (%p583_p8), %s163_s15, 128  }
  0x20   : > { %490 = vsyncadd (%p583_p8), %s163_s15, 4294967168  ;;  %v519_v0 = vmov 0   ;;  %v196_v1 = vld [vmem:[%s660_s1] sm:$0xff]  ;;  %v520_v2 = vmov 1   ;;  %s336_s20 = sshll.u32 %s509_s12, 3  ;;  %s191_s21 = scalar_lea.vmem [#allocation5], %s333_s8 }
  0x21   : > { %403 = vset.pattern.permute.xlu0 %v519_v0  ;;  %s223_s27 = scalar_lea.hbm %s661_s2, %s336_s20  ;;  %v197_v4 = vld [vmem:[%s166_s16] sm:$0xff]  ;;  %s225_s28 = sshll.u32 %s191_s21, 4  ;;  %s226_s28 = int_to_ptr.vmem [resolvable:$true] %s225_s28 }
  0x22   : > { %200 = vperm.xlu0 %403, %v196_v1   ;;  %s227_s29 = sshll.u32 %s223_s27, 4  ;;  %s211_s30 = scalar_lea.sflag [#allocation4], %s610_s7  ;;  %s228_s29 = int_to_ptr.hbm [resolvable:$true] %s227_s29 }
  0x23   : > { %s449_s3 = sshra.s32 %s228_s29, 4  ;;  %s455_s6 = scalar_lea.hbm %s661_s2, 16  ;;  %s450_s3 = int_to_ptr.hbm [resolvable:$true] %s449_s3 }
  0x24   : > { %s451_s4 = scalar_lea.hbm %s450_s3, 8  ;;  %p456_p7 = scmp.lt.s32.totalorder %s450_s3, %s661_s2 }
  0x25   : > { %p452_p4 = scmp.ne.s32.totalorder %s450_s3, %s451_s4  ;;  %p457_p8 = scmp.lt.s32.totalorder %s455_s6, %s451_s4 }
  0x27   : > { %p453_p5 = pnand %p452_p4, %p587_p9  ;;  %p458_p10 = por %p457_p8, %p456_p7 }
  0x29   : > { %p454_p6 = pneg %p453_p5 }
  0x2a   : > { %404 = vset.pattern.permute.xlu0 %v520_v2 }
  0x2b   : > { %205 = vperm.xlu0 %404, %v196_v1   ;;  %p459_p13 = pnand %p458_p10, %p454_p6 }
  0x94   : > { %v201_v3 = vpop.permute.xlu0 %200 }
  0x95   : > { %v203_v5 = vmul.f32 %v201_v3, %v197_v4 }
  0x9d   : > { %v206_v6 = vpop.permute.xlu0 %205 }
  0x9e   : > { %v208_v7 = vadd.f32 %v206_v6, %v203_v5 }
  0xa0   : > { %209 = vst [vmem:[%s191_s21] sm:$0xff] %v208_v7 }
  0xa1   : > { %462 = shalt.err (!%p459_p13)
}
  0xa2   : > { %341 = dma.vmem_to_hbm [thread:$0]  (%p587_p9), %s226_s28, 128, %s228_s29, %s211_s30  }
  0xa3 PF: > { %s239_s7 = sand.u32 1, %s497_s9   ;;  %p348_p0 = pnand %p329_p12, %p594_p11 }
  0xa4   : > { %s240_s16 = scalar_lea.sflag [#allocation4], %s239_s7 }
  0xa5   : > { %p349_p1 = pneg %p348_p0 }
  0xa7   : > { %492 = dma.done.wait (%p349_p1), %s240_s16, 128  }
  0xa8   : > { %494 = vsyncadd (%p349_p1), %s240_s16, 4294967168  ;;  %s18_s14 = sadd.s32 1, %s517_s14   ;;  %s666_s9 = smov %s501_s10 }
  0xa9   : > { %p15_p2 = scmp.ge.s32.totalorder %s18_s14, 4   ;;  %s667_s10 = smov %s505_s11 }
  0xaa   : > { %s668_s11 = smov %s592_s23  ;;  %s669_s12 = smov %s513_s13 }
  0xab   : > { %s670_s13 = smov %s672_s17  ;;  %17 = sbr.rel (!%p15_p2) target bundleno = 6 (0x6), region = 76 }
  0xb0   :  { %246 = vsyncpa [#allocation3], 1 }
  0xb1   :  { %248 = vsyncpa [#allocation3 + $0x1], 1 }
  0xb2   :  { %249 = vsyncpa [#allocation4], 1 }
  0xb3   :  { %251 = vsyncpa [#allocation4 + $0x1], 1 }

</bundles_post_ra>
